<compile_context>
chip_gen: v7x
topology: tpu7x:2x2x1
jax: 0.10.0
libtpu: 0.0.40
codegen_flags: <defaults>
</compile_context>

<pallas_src>
import functools

import jax
import jax.numpy as jnp
from jax.experimental import pallas as pl
from jax.experimental.pallas import tpu as pltpu

_LANES = 128
_ROW_BLOCK = 1024  # 1024 x 128 x 4B = 512 KiB per f32 buffer (~3 MiB with double-buffering)


def _relu_sq_dropout_div_kernel(x_ref, u_ref, o_ref, *, p):
    x = x_ref[...]
    h1 = jnp.maximum(x, 0)                      # ReLU
    h2 = h1 * h1                                # square

    if p >= 1.0:                                # degenerate: everything dropped
        scale = float("inf")
    else:
        scale = 1.0 / (1.0 - p)

    keep = u_ref[...] >= jnp.float32(p)         # keep with prob 1 - p
    h3 = jnp.where(keep, h2 * scale, jnp.zeros_like(h2))   # inverted dropout (train mode)

    # Literal divide: produces inf/nan where dropped / where h1 == 0, like PyTorch.
    o_ref[...] = (h1 / h3).astype(o_ref.dtype)


def model_forward(x, seed, p=0.5):
    """x: floating-point array of any shape (e.g. NCHW). Returns same shape/dtype."""
    orig_shape = x.shape
    dtype = x.dtype
    n = x.size

    flat = x.reshape(-1)
    pad = (-n) % (8 * _LANES)
    if pad:  # only pad when needed (NCHW feature maps are usually already aligned)
        flat = jnp.pad(flat, (0, pad))
    rows = flat.shape[0] // _LANES
    x2d = flat.reshape(rows, _LANES)

    block_rows = min(_ROW_BLOCK, rows)          # rows is a multiple of 8, so is block_rows
    grid = (pl.cdiv(rows, block_rows),)

    # Dropout randomness: portable (TPU hardware + interpret mode), and each grid
    # block reads its own slice -> independent masks per block for free.
    u = jax.random.uniform(jax.random.PRNGKey(seed), (rows, _LANES), dtype=jnp.float32)

    out2d = pl.pallas_call(
        functools.partial(_relu_sq_dropout_div_kernel, p=float(p)),
        out_shape=jax.ShapeDtypeStruct((rows, _LANES), dtype),
        grid=grid,
        in_specs=[
            pl.BlockSpec((block_rows, _LANES), lambda i: (i, 0)),
            pl.BlockSpec((block_rows, _LANES), lambda i: (i, 0)),
        ],
        out_specs=pl.BlockSpec((block_rows, _LANES), lambda i: (i, 0)),
        compiler_params=pltpu.CompilerParams(
            dimension_semantics=("parallel",)),   # shards blocks across v7x's 2 TCs
    )(x2d, u)

    out = out2d.reshape(-1)
    if pad:
        out = out[:n]
    return out.reshape(orig_shape)


if __name__ == "__main__":
    key = jax.random.PRNGKey(0)
    # Small NCHW input consistent with the module's elementwise forward.
    x = jax.random.normal(key, (2, 4, 16, 16), dtype=jnp.float32)

    out = model_forward(x, seed=1234, p=0.5)
    out = jax.block_until_ready(out)

    assert out.shape == x.shape
    assert out.dtype == x.dtype
    print("KERNEL_OK")
</pallas_src>

<mosaic_0001>
module attributes {stable_mosaic.version = 11 : i64} {
  func.func @_relu_sq_dropout_div_kernel(%arg0: i32, %arg1: memref<16x128xf32, #tpu.memory_space<vmem>>, %arg2: memref<16x128xf32, #tpu.memory_space<vmem>>, %arg3: memref<16x128xf32, #tpu.memory_space<vmem>>) attributes {dimension_semantics = [#tpu.dimension_semantics<parallel>], iteration_bounds = array<i64: 1>, scalar_prefetch = 0 : i64, scratch_operands = 0 : i64, tpu.core_type = #tpu.core_type<tc>, window_params = [{transform_indices = @transform_0, window_bounds = array<i64: 16, 128>}, {transform_indices = @transform_1, window_bounds = array<i64: 16, 128>}, {transform_indices = @transform_2, window_bounds = array<i64: 16, 128>}]} {
    %c0 = arith.constant 0 : index
    %c0_0 = arith.constant 0 : index
    %0 = vector.load %arg1[%c0, %c0_0] : memref<16x128xf32, #tpu.memory_space<vmem>>, vector<16x128xf32>
    %cst = arith.constant 0.000000e+00 : f32
    %1 = vector.broadcast %cst : f32 to vector<16x128xf32>
    %2 = arith.maximumf %0, %1 : vector<16x128xf32>
    %3 = arith.mulf %2, %2 : vector<16x128xf32>
    %c0_1 = arith.constant 0 : index
    %c0_2 = arith.constant 0 : index
    %4 = vector.load %arg2[%c0_1, %c0_2] : memref<16x128xf32, #tpu.memory_space<vmem>>, vector<16x128xf32>
    %cst_3 = arith.constant 5.000000e-01 : f32
    %5 = vector.broadcast %cst_3 : f32 to vector<16x128xf32>
    %6 = arith.cmpf oge, %4, %5 : vector<16x128xf32>
    %cst_4 = arith.constant 2.000000e+00 : f32
    %7 = vector.broadcast %cst_4 : f32 to vector<16x128xf32>
    %8 = arith.mulf %3, %7 : vector<16x128xf32>
    %cst_5 = arith.constant 0.000000e+00 : f32
    %9 = vector.broadcast %cst_5 : f32 to vector<16x128xf32>
    %10 = arith.select %6, %8, %9 : vector<16x128xi1>, vector<16x128xf32>
    %11 = arith.divf %2, %10 : vector<16x128xf32>
    %c0_6 = arith.constant 0 : index
    %c0_7 = arith.constant 0 : index
    %12 = vector.load %arg3[%c0_6, %c0_7] : memref<16x128xf32, #tpu.memory_space<vmem>>, vector<16x128xf32>
    tpu.vector_store %arg3[%c0_6, %c0_7], %11 {strides = array<i32>} : memref<16x128xf32, #tpu.memory_space<vmem>>, vector<16x128xf32>,
    return
  }
  func.func @transform_0(%arg0: i32) -> (i32, i32) {
    %c0_i32 = arith.constant 0 : i32
    %c0_i32_0 = arith.constant 0 : i32
    return %arg0, %c0_i32 : i32, i32
  }
  func.func @transform_1(%arg0: i32) -> (i32, i32) {
    %c0_i32 = arith.constant 0 : i32
    %c0_i32_0 = arith.constant 0 : i32
    return %arg0, %c0_i32 : i32, i32
  }
  func.func @transform_2(%arg0: i32) -> (i32, i32) {
    %c0_i32 = arith.constant 0 : i32
    %c0_i32_0 = arith.constant 0 : i32
    return %arg0, %c0_i32 : i32, i32
  }
}

</mosaic_0001>

<bundles_post_ra>
// kernel: tpu_custom_call.1
= control target key start
LH: loop header
LB: loop body
LE: loop exit
PB: predicated region body
PF: predicated region fallthrough
CT: control target
= control target key end

     0   :  { %7 = vsyncpa [#allocation3], 0  ;;  %s224_s0 = inlined_call_operand.hbm [shape: f32[16,128], index: 0, kind: input, shape index: {}]   ;;  %s225_s1 = inlined_call_operand.hbm [shape: f32[16,128], index: 1, kind: input, shape index: {}]   ;;  %s226_s2 = inlined_call_operand.hbm [shape: f32[16,128], index: 2, kind: output, shape index: {}]  }
   0x1   :  { %8 = vsyncpa [#allocation6], 0 }
   0x2   :  { %9 = vsyncpa [#allocation4], 0  ;;  %s159_s9 = smov [#allocation2]   ;;  %s87_s13 = scalar_lea.hbm %s224_s0, 256 }
   0x3   :  { %s15_s10 = sshll.u32 %s159_s9, 4  ;;  %p88_p0 = scmp.ne.s32.totalorder %s224_s0, %s87_s13  ;;  %s16_s10 = int_to_ptr.vmem [resolvable:$true] %s15_s10 }
   0x4   :  { %p91_p1 = scmp.lt.u32.totalorder %s87_s13, %s224_s0 }
   0x6   :  { %p93_p2 = pnand %p91_p1, %p88_p0 }
   0x8   :  { %96 = shalt.err (!%p93_p2)
}
   0x9   :  { %s97_s18 = scalar_lea.vmem %s16_s10, 256  ;;  %p102_p4 = scmp.lt.s32.totalorder %s16_s10, %s16_s10 }
   0xa   :  { %p98_p3 = scmp.ne.s32.totalorder %s16_s10, %s97_s18  ;;  %p103_p5 = scmp.lt.s32.totalorder %s97_s18, %s97_s18 }
   0xc   :  { %p104_p6 = por %p103_p5, %p102_p4 }
   0xe   :  { %p105_p7 = pnand %p104_p6, %p98_p3 }
  0x10   :  { %108 = shalt.err (!%p105_p7)
}
  0x11   :  { %s160_s19 = smov 128   ;;  %s161_s20 = smov 8  }
  0x12   :  { %21 = dma.hbm_to_vmem [thread:$0]  %s224_s0, 256, %s16_s10, [#allocation3], %s160_s19, %s160_s19, %s161_s20  }
  0x13   :  { %s162_s23 = smov [#allocation5]   ;;  %s109_s27 = scalar_lea.hbm %s225_s1, 256 }
  0x14   :  { %s27_s24 = sshll.u32 %s162_s23, 4  ;;  %p110_p8 = scmp.ne.s32.totalorder %s225_s1, %s109_s27  ;;  %s28_s24 = int_to_ptr.vmem [resolvable:$true] %s27_s24 }
  0x15   :  { %p113_p9 = scmp.lt.u32.totalorder %s109_s27, %s225_s1 }
  0x17   :  { %p115_p10 = pnand %p113_p9, %p110_p8 }
  0x19   :  { %118 = shalt.err (!%p115_p10)
}
  0x1a   :  { %s119_s4 = scalar_lea.vmem %s28_s24, 256  ;;  %p124_p12 = scmp.lt.s32.totalorder %s28_s24, %s28_s24 }
  0x1b   :  { %p120_p11 = scmp.ne.s32.totalorder %s28_s24, %s119_s4  ;;  %p125_p13 = scmp.lt.s32.totalorder %s119_s4, %s119_s4 }
  0x1d   :  { %p126_p0 = por %p125_p13, %p124_p12 }
  0x1f   :  { %p127_p1 = pnand %p126_p0, %p120_p11 }
  0x21   :  { %130 = shalt.err (!%p127_p1)
}
  0x22   :  { %33 = dma.hbm_to_vmem [thread:$0]  %s225_s1, 256, %s28_s24, [#allocation6], %s160_s19, %s160_s19, %s161_s20  }
  0x23   :  { %153 = dma.done.wait [#allocation3], 256  }
  0x24   :  { %154 = vsyncadd [#allocation3], 4294967040 }
  0x25   :  { %155 = dma.done.wait [#allocation6], 256  }
  0x26   :  { %156 = vsyncadd [#allocation6], 4294967040  ;;  %v40_v0 = vld [vmem:[#allocation2] sm:$0xff]  ;;  %v41_v1 = vld [vmem:[#allocation2 + $0x8] sm:$0xff]  ;;  %s163_s1 = smov [#allocation7]  }
  0x27   :  { %v42_v2 = vmax.f32 %v40_v0, 0.0  ;;  %v46_v3 = vld [vmem:[#allocation5] sm:$0xff]  ;;  %v43_v4 = vmax.f32 %v41_v1, 0.0  ;;  %v47_v5 = vld [vmem:[#allocation5 + $0x8] sm:$0xff]  ;;  %s65_s6 = sshll.u32 %s163_s1, 4  ;;  %s66_s6 = int_to_ptr.vmem [resolvable:$true] %s65_s6 }
  0x28   :  { %vm48_vm0 = vcmp.ge.f32.partialorder %v46_v3, 0.5  ;;  %vm49_vm1 = vcmp.ge.f32.partialorder %v47_v5, 0.5  ;;  %s131_s7 = scalar_lea.vmem %s66_s6, 256  ;;  %p136_p3 = scmp.lt.s32.totalorder %s66_s6, %s66_s6 }
  0x29   :  { %v44_v6 = vmul.f32 %v42_v2, %v42_v2  ;;  %v45_v7 = vmul.f32 %v43_v4, %v43_v4  ;;  %p132_p2 = scmp.ne.s32.totalorder %s66_s6, %s131_s7  ;;  %p137_p4 = scmp.lt.s32.totalorder %s131_s7, %s131_s7 }
  0x2b   :  { %v50_v8 = vmul.f32 2.0, %v44_v6  ;;  %v51_v9 = vmul.f32 2.0, %v45_v7  ;;  %p138_p5 = por %p137_p4, %p136_p3 }
  0x2d   :  { %v52_v10 = vsel %vm48_vm0, %v50_v8, 0.0  ;;  %v53_v11 = vsel %vm49_vm1, %v51_v9, 0.0  ;;  %p139_p6 = pnand %p138_p5, %p132_p2 }
  0x2e   :  { %83 = vrcp.f32 %v52_v10 }
  0x2f   :  { %85 = vrcp.f32 %v53_v11 }
  0x38   :  { %v84_v12 = vpop.eup %83 }
  0x39   :  { %v86_v13 = vpop.eup %85  ;;  %v55_v14 = vmul.f32 %v84_v12, %v42_v2 }
  0x3a   :  { %v57_v15 = vmul.f32 %v86_v13, %v43_v4 }
  0x3b   :  { %58 = vst [vmem:[#allocation7] sm:$0xff] %v55_v14 }
  0x3c   :  { %59 = vst [vmem:[#allocation7 + $0x8] sm:$0xff] %v57_v15 }
  0x3d   :  { %142 = shalt.err (!%p139_p6)
}
  0x3e   :  { %s143_s10 = scalar_lea.hbm %s226_s2, 256 }
  0x3f   :  { %p144_p7 = scmp.ne.s32.totalorder %s226_s2, %s143_s10  ;;  %p147_p8 = scmp.lt.u32.totalorder %s143_s10, %s226_s2 }
  0x41   :  { %p149_p9 = pnand %p147_p8, %p144_p7 }
  0x43   :  { %152 = shalt.err (!%p149_p9)
}
  0x44   :  { %71 = dma.vmem_to_hbm [thread:$0]  %s66_s6, 256, %s226_s2, [#allocation4], %s160_s19, %s160_s19, %s161_s20  }
  0x45   :  { %157 = dma.done.wait [#allocation4], 256  }
  0x46   :  { %158 = vsyncadd [#allocation4], 4294967040 }
  0x47   :  { %75 = vsyncpa [#allocation3], 1 }
  0x48   :  { %76 = vsyncpa [#allocation6], 1 }
  0x49   :  { %77 = vsyncpa [#allocation4], 1 }

</bundles_post_ra>
